<compile_context>
chip_gen: v6e
topology: v6e:2x2x1
jax: 0.10.0
libtpu: 0.0.40
codegen_flags: <defaults>
</compile_context>

<pallas_src>
import functools

import jax
import jax.numpy as jnp
from jax.experimental import pallas as pl
from jax.experimental.pallas import tpu as pltpu


# ---------------------------------------------------------------------------
# kernels
# ---------------------------------------------------------------------------
def _resblock_identity_kernel(x_ref, w_ref, b_ref, o_ref, *, tn):
    """o = x + silu(x @ W + b)   (Identity residual, num_condition == 0)."""
    n = pl.program_id(1)
    xb = x_ref[...].astype(jnp.bfloat16)                       # bf16 MXU inputs
    z = jnp.dot(xb, w_ref[...], preferred_element_type=jnp.float32) + b_ref[...]
    silu = z * pl.reciprocal(1.0 + jnp.exp(-z), approx=True)   # exp + rcp on EUP
    start = pl.multiple_of(n * tn, 128)
    res = x_ref[:, pl.ds(start, tn)].astype(jnp.float32)       # exact residual
    o_ref[...] = (res + silu).astype(o_ref.dtype)


def _resblock_condition_kernel(x_ref, w_ref, b_ref, o_ref, *, tn):
    """o = (x @ Wr + br) + silu(x @ W + b); W and Wr column blocks are fused
    into one (K, 2*tn) operand so x makes a single MXU pass per grid step."""
    xb = x_ref[...].astype(jnp.bfloat16)
    zc = jnp.dot(xb, w_ref[...], preferred_element_type=jnp.float32) + b_ref[...]
    z, res = zc[:, :tn], zc[:, tn:]                            # 128-lane split
    silu = z * pl.reciprocal(1.0 + jnp.exp(-z), approx=True)
    o_ref[...] = (res + silu).astype(o_ref.dtype)


# ---------------------------------------------------------------------------
# helpers
# ---------------------------------------------------------------------------
def _round_up(v, m):
    return (v + m - 1) // m * m


def _vmem_caps():
    """(tiling budget, scoped-VMEM limit) in bytes, chip-aware when possible."""
    try:
        cap = int(pltpu.get_tpu_info().vmem_capacity_bytes)
    except Exception:
        cap = 64 * 1024 * 1024          # conservative: v7x per-TensorCore VMEM
    return int(cap * 0.5), int(cap * 0.85)


def _choose_tiles(m, k, h_pad, fused, x_bytes, o_bytes, budget):
    """Largest (tm, tn) whose double-buffered working set fits the budget.

    tm only needs to be a multiple of 8 (sublane granularity), so for
    small/medium M we prefer an exact fit over rounding up to 128 — this cuts
    wasted MXU passes and padded-row HBM traffic for ragged batch*seq."""
    m_eff = _round_up(max(m, 1), 8)
    if m_eff <= 1024:
        tm_cands = [m_eff] + [t for t in (512, 256, 128, 64, 32, 16, 8)
                              if t < m_eff]
    else:
        tm_cands = [1024, 512, 256, 128]
    nb = h_pad // 128
    tn_cands = [d * 128 for d in range(nb, 0, -1) if nb % d == 0]
    for tm in tm_cands:
        for tn in tn_cands:
            use = (2 * tm * k * x_bytes            # x block (2 pipeline bufs)
                   + 2 * k * fused * tn * 2        # bf16 weight block(s)
                   + 2 * 8 * fused * tn * 4        # f32 bias block
                   + 2 * tm * tn * o_bytes)        # output block
            if use <= budget:
                return tm, tn
    # TODO(synk): add K-dim (hidden_in) tiling with an f32 scratch accumulator
    # for hidden sizes whose (K, 128) weight column block alone exceeds VMEM.
    return tm_cands[-1], 128


_BUFFERED1 = None


def _single_buffer_supported():
    """Probe once whether pipeline_mode=pl.Buffered(1) (single-buffering of
    grid-invariant operands) lowers on this jax/libtpu build."""
    global _BUFFERED1
    if _BUFFERED1 is None:
        def _probe(x_ref, o_ref):
            o_ref[...] = x_ref[...] + 1.0
        try:
            fn = pl.pallas_call(
                _probe,
                out_shape=jax.ShapeDtypeStruct((8, 128), jnp.float32),
                grid=(2,),
                in_specs=[pl.BlockSpec((8, 128), lambda i: (0, 0),
                                       pipeline_mode=pl.Buffered(1))],
                out_specs=pl.BlockSpec((8, 128), lambda i: (0, 0)),
            )
            jax.block_until_ready(fn(jnp.zeros((8, 128), jnp.float32)))
            _BUFFERED1 = True
        except Exception:
            _BUFFERED1 = False
    return _BUFFERED1


def _interleave_blocks(a, b, tn):
    """Interleave tn-wide blocks of a and b along the last axis so that block
    j of the result is [a[..., j*tn:(j+1)*tn], b[..., j*tn:(j+1)*tn]]."""
    lead, hp = a.shape[:-1], a.shape[-1]
    nb = hp // tn
    s = jnp.stack([a.reshape(lead + (nb, tn)), b.reshape(lead + (nb, tn))],
                  axis=-2)
    return s.reshape(lead + (2 * hp,))


# ---------------------------------------------------------------------------
# forward
# ---------------------------------------------------------------------------
@functools.partial(
    jax.jit,
    static_argnames=("num_condition", "tm", "tn", "single_w", "vmem_limit"))
def _resblock_impl(x, w, b, wr, br, *, num_condition, tm, tn, single_w,
                   vmem_limit):
    orig_shape = x.shape
    k_in = orig_shape[-1]
    hidden = w.shape[1]
    out_dtype = x.dtype

    h_pad = _round_up(hidden, 128)
    fused = 1 if num_condition == 0 else 2
    k_pad = h_pad if num_condition == 0 else k_in

    x2 = x.reshape(-1, k_in)
    m = x2.shape[0]
    m_pad = _round_up(max(m, 1), tm)
    if m_pad != m or k_pad != k_in:
        x2 = jnp.pad(x2, ((0, m_pad - m), (0, k_pad - k_in)))

    if num_condition == 0:
        # K == N == hidden: pad both together so the residual slice of x lines
        # up with the padded output columns.
        w_call = jnp.zeros((k_pad, h_pad), jnp.bfloat16)
        w_call = w_call.at[:k_in, :hidden].set(w.astype(jnp.bfloat16))
        b_call = jnp.zeros((1, h_pad), jnp.float32)
        b_call = b_call.at[:, :hidden].set(
            b.astype(jnp.float32).reshape(1, hidden))
        kernel = functools.partial(_resblock_identity_kernel, tn=tn)
        wn = tn
    else:
        w_pd = jnp.zeros((k_in, h_pad), jnp.bfloat16)
        w_pd = w_pd.at[:, :hidden].set(w.astype(jnp.bfloat16))
        wr_pd = jnp.zeros((k_in, h_pad), jnp.bfloat16)
        wr_pd = wr_pd.at[:, :hidden].set(wr.astype(jnp.bfloat16))
        b_pd = jnp.zeros((h_pad,), jnp.float32).at[:hidden].set(
            b.astype(jnp.float32))
        br_pd = jnp.zeros((h_pad,), jnp.float32).at[:hidden].set(
            br.astype(jnp.float32))
        w_call = _interleave_blocks(w_pd, wr_pd, tn)            # (K, 2*h_pad)
        b_call = _interleave_blocks(b_pd, br_pd, tn).reshape(1, 2 * h_pad)
        kernel = functools.partial(_resblock_condition_kernel, tn=tn)
        wn = 2 * tn

    def _const_spec(shape, imap):
        # single-buffer grid-invariant weight/bias blocks when supported
        if single_w:
            return pl.BlockSpec(shape, imap, pipeline_mode=pl.Buffered(1))
        return pl.BlockSpec(shape, imap)

    grid = (m_pad // tm, h_pad // tn)
    x_spec = pl.BlockSpec((tm, k_pad), lambda i, n: (i, 0))
    w_spec = _const_spec((k_pad, wn), lambda i, n: (0, n))
    b_spec = _const_spec((1, wn), lambda i, n: (0, n))
    o_spec = pl.BlockSpec((tm, tn), lambda i, n: (i, n))

    xi = jnp.dtype(x.dtype).itemsize
    oi = jnp.dtype(out_dtype).itemsize
    cost = pl.CostEstimate(
        flops=2 * m_pad * k_pad * fused * h_pad + 8 * m_pad * h_pad,
        transcendentals=m_pad * h_pad,
        bytes_accessed=(m_pad * k_pad * xi + k_pad * fused * h_pad * 2
                        + fused * h_pad * 4 + m_pad * h_pad * oi),
    )

    out = pl.pallas_call(
        kernel,
        out_shape=jax.ShapeDtypeStruct((m_pad, h_pad), out_dtype),
        grid_spec=pltpu.PrefetchScalarGridSpec(
            num_scalar_prefetch=0,
            grid=grid,
            in_specs=[x_spec, w_spec, b_spec],
            out_specs=o_spec,
        ),
        compiler_params=pltpu.CompilerParams(
            dimension_semantics=("parallel", "parallel"),
            vmem_limit_bytes=vmem_limit,
        ),
        cost_estimate=cost,
    )(x2, w_call, b_call)

    out = out[:m, :hidden]
    return out.reshape(orig_shape[:-1] + (hidden,))


def resblock_forward(x, w, b, wr=None, br=None, *, num_condition=0):
    """ResBlock forward.  x: [..., hidden_in]; w: [hidden_in, hidden]
    (transpose of torch nn.Linear's [out, in]); b: [hidden]; wr/br: residual
    Linear params when num_condition > 0."""
    hidden = w.shape[1]
    k_in = x.shape[-1]
    m = 1
    for d in x.shape[:-1]:
        m *= int(d)
    h_pad = _round_up(hidden, 128)
    fused = 1 if num_condition == 0 else 2
    k_pad = h_pad if num_condition == 0 else k_in

    budget, vmem_limit = _vmem_caps()
    itemsize = jnp.dtype(x.dtype).itemsize
    tm, tn = _choose_tiles(m, k_pad, h_pad, fused, itemsize, itemsize, budget)

    # Megacore (v7x): if the problem collapsed to a single grid step, split the
    # feature axis so both TensorCores get work.  An N-split adds no padding
    # waste (h_pad stays a multiple of tn); it is a no-op cost on 1-TC chips.
    m_pad = _round_up(max(m, 1), tm)
    if (m_pad // tm) * (h_pad // tn) < 2 and tn % 256 == 0:
        tn //= 2

    single_w = (h_pad == tn) and _single_buffer_supported()

    return _resblock_impl(x, w, b, wr, br, num_condition=num_condition,
                          tm=tm, tn=tn, single_w=single_w,
                          vmem_limit=vmem_limit)


# ---------------------------------------------------------------------------
# deterministic parameter init matching the module's __init__ semantics
# ---------------------------------------------------------------------------
def init_resblock_params(key, hidden_size, num_condition=0, dtype=jnp.float32):
    in_features = hidden_size * (num_condition + 1)
    k_b, k_wr, k_br = jax.random.split(key, 3)
    bound = 1.0 / (in_features ** 0.5)
    # linear.weight is zero-initialized in the module; bias keeps default init.
    w = jnp.zeros((in_features, hidden_size), dtype)       # stored as [in, out]
    b = jax.random.uniform(k_b, (hidden_size,), dtype, -bound, bound)
    if num_condition > 0:
        wr = jax.random.uniform(k_wr, (in_features, hidden_size), dtype,
                                -bound, bound)
        br = jax.random.uniform(k_br, (hidden_size,), dtype, -bound, bound)
        return w, b, wr, br
    return w, b, None, None


def _silu(z):
    return z * jax.nn.sigmoid(z)


if __name__ == "__main__":
    key = jax.random.PRNGKey(0)
    k_x0, k_x1, k_x2, k_p0, k_p1, k_p2 = jax.random.split(key, 6)

    # ---- case 1: num_condition = 0 (Identity residual), hidden = 32 ----
    batch, seq, hidden = 2, 8, 32
    x0 = jax.random.normal(k_x0, (batch, seq, hidden), jnp.float32)
    w0, b0, _, _ = init_resblock_params(k_p0, hidden, num_condition=0)
    y0 = resblock_forward(x0, w0, b0, num_condition=0)
    jax.block_until_ready(y0)
    ref0 = x0 + _silu(x0 @ w0 + b0)          # linear.weight is zero-init
    assert y0.shape == ref0.shape
    assert jnp.allclose(y0, ref0, atol=5e-3, rtol=5e-3), "nc=0 mismatch"

    # ---- case 2: num_condition = 1 (Linear residual), hidden = 32 ----
    nc = 1
    x1 = jax.random.normal(k_x1, (batch, seq, hidden * (nc + 1)), jnp.float32)
    w1, b1, wr1, br1 = init_resblock_params(k_p1, hidden, num_condition=nc)
    y1 = resblock_forward(x1, w1, b1, wr1, br1, num_condition=nc)
    jax.block_until_ready(y1)
    ref1 = (x1 @ wr1 + br1) + _silu(x1 @ w1 + b1)
    # bf16 MXU inputs -> compare against the f32 reference with loose tolerance
    assert jnp.allclose(y1, ref1, atol=5e-2, rtol=5e-2), "nc=1 mismatch"

    # ---- case 3: ragged M (300 rows) and hidden not a multiple of 128 ----
    nc, hidden3 = 1, 160
    x2 = jax.random.normal(k_x2, (3, 100, hidden3 * (nc + 1)), jnp.float32)
    w2, b2, wr2, br2 = init_resblock_params(k_p2, hidden3, num_condition=nc)
    y2 = resblock_forward(x2, w2, b2, wr2, br2, num_condition=nc)
    jax.block_until_ready(y2)
    ref2 = (x2 @ wr2 + br2) + _silu(x2 @ w2 + b2)
    assert jnp.allclose(y2, ref2, atol=5e-2, rtol=5e-2), "padded-shape mismatch"

    print("KERNEL_OK")
</pallas_src>

<mosaic_0001>
module attributes {stable_mosaic.version = 11 : i64} {
  func.func @_probe(%arg0: i32, %arg1: memref<8x128xf32, #tpu.memory_space<vmem>>, %arg2: memref<8x128xf32, #tpu.memory_space<vmem>>) attributes {dimension_semantics = [#tpu.dimension_semantics<arbitrary>], iteration_bounds = array<i64: 2>, scalar_prefetch = 0 : i64, scratch_operands = 0 : i64, tpu.core_type = #tpu.core_type<tc>, window_params = [{pipeline_mode = #tpu.pipeline_mode<synchronous>, transform_indices = @transform_0, window_bounds = array<i64: 8, 128>}, {pipeline_mode = #tpu.pipeline_mode<synchronous>, transform_indices = @transform_1, window_bounds = array<i64: 8, 128>}]} {
    %c0 = arith.constant 0 : index
    %c0_0 = arith.constant 0 : index
    %0 = vector.load %arg1[%c0, %c0_0] : memref<8x128xf32, #tpu.memory_space<vmem>>, vector<8x128xf32>
    %cst = arith.constant 1.000000e+00 : f32
    %1 = vector.broadcast %cst : f32 to vector<8x128xf32>
    %2 = arith.addf %0, %1 : vector<8x128xf32>
    %c0_1 = arith.constant 0 : index
    %c0_2 = arith.constant 0 : index
    %3 = vector.load %arg2[%c0_1, %c0_2] : memref<8x128xf32, #tpu.memory_space<vmem>>, vector<8x128xf32>
    tpu.vector_store %arg2[%c0_1, %c0_2], %2 {strides = array<i32>} : memref<8x128xf32, #tpu.memory_space<vmem>>, vector<8x128xf32>,
    return
  }
  func.func @transform_0(%arg0: i32) -> (i32, i32) {
    %c0_i32 = arith.constant 0 : i32
    %c0_i32_0 = arith.constant 0 : i32
    %c0_i32_1 = arith.constant 0 : i32
    return %c0_i32, %c0_i32_0 : i32, i32
  }
  func.func @transform_1(%arg0: i32) -> (i32, i32) {
    %c0_i32 = arith.constant 0 : i32
    %c0_i32_0 = arith.constant 0 : i32
    %c0_i32_1 = arith.constant 0 : i32
    return %c0_i32, %c0_i32_0 : i32, i32
  }
}

module attributes {stable_mosaic.version = 11 : i64} {
  func.func @_resblock_identity_kernel(%arg0: i32, %arg1: i32, %arg2: memref<16x128xf32, #tpu.memory_space<vmem>>, %arg3: memref<128x128xbf16, #tpu.memory_space<vmem>>, %arg4: memref<1x128xf32, #tpu.memory_space<vmem>>, %arg5: memref<16x128xf32, #tpu.memory_space<vmem>>) attributes {dimension_semantics = [#tpu.dimension_semantics<parallel>, #tpu.dimension_semantics<parallel>], iteration_bounds = array<i64: 1, 1>, scalar_prefetch = 0 : i64, scratch_operands = 0 : i64, tpu.core_type = #tpu.core_type<tc>, window_params = [{transform_indices = @transform_0, window_bounds = array<i64: 16, 128>}, {transform_indices = @transform_1, window_bounds = array<i64: 128, 128>}, {transform_indices = @transform_2, window_bounds = array<i64: 1, 128>}, {transform_indices = @transform_3, window_bounds = array<i64: 16, 128>}]} {
    %c0 = arith.constant 0 : index
    %c0_0 = arith.constant 0 : index
    %0 = vector.load %arg2[%c0, %c0_0] : memref<16x128xf32, #tpu.memory_space<vmem>>, vector<16x128xf32>
    %1 = arith.truncf %0 : vector<16x128xf32> to vector<16x128xbf16>
    %c0_1 = arith.constant 0 : index
    %c0_2 = arith.constant 0 : index
    %2 = vector.load %arg3[%c0_1, %c0_2] : memref<128x128xbf16, #tpu.memory_space<vmem>>, vector<128x128xbf16>
    %cst = arith.constant dense<0.000000e+00> : vector<16x128xf32>
    %3 = tpu.matmul %1, %2, %cst {dimension_numbers = #tpu.dot_dimension_numbers<[1], [0], [0], [1], [0, 0, 1, 1], [], []>} : vector<16x128xbf16>, vector<128x128xbf16>, vector<16x128xf32> -> vector<16x128xf32>
    %c0_3 = arith.constant 0 : index
    %c0_4 = arith.constant 0 : index
    %4 = vector.load %arg4[%c0_3, %c0_4] : memref<1x128xf32, #tpu.memory_space<vmem>>, vector<1x128xf32>
    %5 = vector.broadcast %4 : vector<1x128xf32> to vector<16x128xf32>
    %6 = arith.addf %3, %5 : vector<16x128xf32>
    %cst_5 = arith.constant 0.000000e+00 : f32
    %7 = vector.broadcast %cst_5 : f32 to vector<16x128xf32>
    %8 = arith.subf %7, %6 : vector<16x128xf32>
    %9 = math.exp %8 : vector<16x128xf32>
    %cst_6 = arith.constant 1.000000e+00 : f32
    %10 = vector.broadcast %cst_6 : f32 to vector<16x128xf32>
    %11 = arith.addf %10, %9 : vector<16x128xf32>
    %12 = tpu.reciprocal %11 {approx = true} : vector<16x128xf32> -> vector<16x128xf32>
    %13 = arith.mulf %6, %12 : vector<16x128xf32>
    %c128_i32 = arith.constant 128 : i32
    %14 = arith.muli %arg1, %c128_i32 : i32
    %15 = tpu.assume_multiple %14, 128 : i32
    %c0_7 = arith.constant 0 : index
    %16 = arith.index_cast %15 : i32 to index
    %17 = vector.load %arg2[%c0_7, %16] : memref<16x128xf32, #tpu.memory_space<vmem>>, vector<16x128xf32>
    %18 = arith.addf %17, %13 : vector<16x128xf32>
    %c0_8 = arith.constant 0 : index
    %c0_9 = arith.constant 0 : index
    %19 = vector.load %arg5[%c0_8, %c0_9] : memref<16x128xf32, #tpu.memory_space<vmem>>, vector<16x128xf32>
    tpu.vector_store %arg5[%c0_8, %c0_9], %18 {strides = array<i32>} : memref<16x128xf32, #tpu.memory_space<vmem>>, vector<16x128xf32>,
    return
  }
  func.func @transform_0(%arg0: i32, %arg1: i32) -> (i32, i32) {
    %c0_i32 = arith.constant 0 : i32
    %c0_i32_0 = arith.constant 0 : i32
    return %arg0, %c0_i32 : i32, i32
  }
  func.func @transform_1(%arg0: i32, %arg1: i32) -> (i32, i32) {
    %c0_i32 = arith.constant 0 : i32
    %c0_i32_0 = arith.constant 0 : i32
    return %c0_i32, %arg1 : i32, i32
  }
  func.func @transform_2(%arg0: i32, %arg1: i32) -> (i32, i32) {
    %c0_i32 = arith.constant 0 : i32
    %c0_i32_0 = arith.constant 0 : i32
    return %c0_i32, %arg1 : i32, i32
  }
  func.func @transform_3(%arg0: i32, %arg1: i32) -> (i32, i32) {
    %c0_i32 = arith.constant 0 : i32
    return %arg0, %arg1 : i32, i32
  }
}

</mosaic_0001>

<bundles_post_ra>
// kernel: tpu_custom_call.1
= control target key start
LH: loop header
LB: loop body
LE: loop exit
PB: predicated region body
PF: predicated region fallthrough
CT: control target
= control target key end

     0   :  { %6 = vsyncpa [#allocation3], 0  ;;  %s305_s0 = inlined_call_operand.hbm [shape: f32[8,128], index: 0, kind: input, shape index: {}]   ;;  %s306_s1 = inlined_call_operand.hbm [shape: f32[8,128], index: 1, kind: output, shape index: {}]  }
   0x1   :  { %7 = vsyncpa [#allocation4], 0  ;;  %s258_s6 = smov 0  }
   0x2 LB: > { %s145_s7 = sadd.s32 4294967295, %s244_s6   ;;  %p146_p0 = scmp.ge.s32.totalorder %s244_s6, 1  ;;  %s244_s6 = sphi %s258_s6, %s13_s6  }
   0x3   : > { %p60_p1 = scmp.lt.s32.totalorder %s244_s6, 3  ;;  %p270_p3 = scmp.eq.s32.totalorder %s145_s7, 0 }
   0x4   : > { %s246_s10 = smov [#allocation2]  }
   0x5   : > { %p266_p2 = pnand %p146_p0, %p60_p1  ;;  %s73_s11 = sshll.u32 %s246_s10, 4  ;;  %s74_s11 = int_to_ptr.vmem [resolvable:$true] %s73_s11 }
   0x6   : > { %s191_s12 = scalar_lea.vmem %s74_s11, 128  ;;  %p199_p10 = scmp.lt.s32.totalorder %s74_s11, %s74_s11 }
   0x7   : > { %p162_p4 = pneg %p266_p2  ;;  %p192_p7 = scmp.ne.s32.totalorder %s74_s11, %s191_s12 }
   0x8   : > { %p200_p11 = scmp.lt.s32.totalorder %s191_s12, %s191_s12 }
   0x9   : > { %p163_p5 = pnand %p270_p3, %p162_p4 }
   0xa   : > { %p201_p12 = por %p200_p11, %p199_p10 }
   0xb   : > { %p182_p6 = pneg %p163_p5 }
   0xd   : > { %p194_p8 = pnand %p192_p7, %p182_p6 }
   0xf   : > { %p195_p9 = pneg %p194_p8 }
  0x11   : > { %p202_p13 = pnand %p201_p12, %p195_p9 }
  0x13   : > { %205 = shalt.err (!%p202_p13)
}
  0x14   : > { %165 = dma.hbm_to_vmem [thread:$0]  (!%p163_p5), %s305_s0, 128, %s74_s11, [#allocation3]  }
  0x15   : > { %86 = sbr.rel (%p266_p2) target bundleno = 42 (0x2a), region = 24 }
  0x1a   : > { %235 = dma.done.wait (%p270_p3), [#allocation3], 128  }
  0x1b   : > { %237 = vsyncadd (%p270_p3), [#allocation3], 4294967168  ;;  %s247_s15 = smov [#allocation5]   ;;  %v96_v0 = vld [vmem:[#allocation2] sm:$0xff]  ;;  %p287_p0 = scmp.eq.s32.totalorder %s145_s7, 1 }
  0x1c   : > { %s106_s16 = sshll.u32 %s247_s15, 4  ;;  %v97_v1 = vadd.f32 1.0, %v96_v0  ;;  %s107_s16 = int_to_ptr.vmem [resolvable:$true] %s106_s16 }
  0x1d   : > { %s206_s18 = scalar_lea.vmem %s107_s16, 128  ;;  %p213_p5 = scmp.lt.s32.totalorder %s107_s16, %s107_s16 }
  0x1e   : > { %98 = vst [vmem:[#allocation5] sm:$0xff] %v97_v1  ;;  %p207_p1 = scmp.ne.s32.totalorder %s107_s16, %s206_s18  ;;  %p214_p6 = scmp.lt.s32.totalorder %s206_s18, %s206_s18 }
  0x20   : > { %p208_p2 = pnand %p207_p1, %p287_p0  ;;  %p215_p7 = por %p214_p6, %p213_p5 }
  0x22   : > { %p209_p4 = pneg %p208_p2 }
  0x24   : > { %p216_p3 = pnand %p215_p7, %p209_p4 }
  0x26   : > { %219 = shalt.err (!%p216_p3)
}
  0x27   : > { %159 = dma.vmem_to_hbm [thread:$0]  (%p287_p0), %s107_s16, 128, %s306_s1, [#allocation4]  }
  0x28   : > { %239 = dma.done.wait (%p287_p0), [#allocation4], 128  }
  0x29   : > { %241 = vsyncadd (%p287_p0), [#allocation4], 4294967168 }
  0x2a PF: > { %s13_s6 = sadd.s32 1, %s244_s6  }
  0x2b   : > { %p10_p8 = scmp.ge.s32.totalorder %s13_s6, 4  }
  0x2d   :  { %12 = sbr.rel (!%p10_p8) target bundleno = 2 (0x2), region = 53 }
  0x32   :  { %119 = vsyncpa [#allocation3], 1 }
  0x33   :  { %121 = vsyncpa [#allocation3 + $0x1], 1 }
  0x34   :  { %122 = vsyncpa [#allocation4], 1 }
  0x35   :  { %124 = vsyncpa [#allocation4 + $0x1], 1 }

// kernel: _resblock_impl.1
= control target key start
LH: loop header
LB: loop body
LE: loop exit
PB: predicated region body
PF: predicated region fallthrough
CT: control target
= control target key end

     0   :  { %v213_v0 = vmov 0.0   ;;  %vm214_vm0 = vmmov 0   ;;  %s274_s1 = inlined_call_operand.vmem [shape: bf16[128,128], index: 1, kind: input, shape index: {}]   ;;  %s275_s0 = inlined_call_operand.vmem [shape: f32[16,128], index: 0, kind: input, shape index: {}]   ;;  %s276_s2 = inlined_call_operand.vmem [shape: f32[1,128], index: 2, kind: input, shape index: {}]   ;;  %s277_s3 = inlined_call_operand.vmem [shape: f32[16,128], index: 3, kind: output, shape index: {}]  }
   0x1   :  { %175 = vmatprep.subr.bf16.mxu0 %v213_v0  ;;  %v197_v1 = vld [vmem:[%s274_s1 + $0x38] sm:$0xff]   ;;  %191 = vmatprep.mubr.msk.bf16.mxu0 %vm214_vm0, %v213_v0  ;;  %v198_v2 = vld [vmem:[%s274_s1 + $0x30] sm:$0xff]   ;;  %v199_v3 = vld [vmem:[%s274_s1 + $0x28] sm:$0xff]  }
   0x2   :  { %176 = vmatpush3.bf16.msra.mxu0 %v197_v1  ;;  %v200_v4 = vld [vmem:[%s274_s1 + $0x20] sm:$0xff]   ;;  %v201_v5 = vld [vmem:[%s274_s1 + $0x18] sm:$0xff]   ;;  %v202_v6 = vld [vmem:[%s274_s1 + $0x10] sm:$0xff]  }
   0x3   :  { %177 = vmatprep.subr.bf16.mxu0 %v213_v0  ;;  %v203_v7 = vld [vmem:[%s274_s1 + $0x8] sm:$0xff]   ;;  %v204_v8 = vld [vmem:[%s274_s1] sm:$0xff]  }
   0x4   :  { %v15_v9 = vld [vmem:[%s275_s0] sm:$0xff]  ;;  %v16_v10 = vld [vmem:[%s275_s0 + $0x8] sm:$0xff] }
   0x5   :  { %v17_v11 = vpack.c.bf16 %v16_v10, %v15_v9  ;;  %v157_v12 = vld [vmem:[%s276_s2] ss:$0 sm:$0xff] }
   0x6   :  { %178 = vmatpush3.bf16.msra.mxu0 %v198_v2 }
   0x7   :  { %179 = vmatprep.subr.bf16.mxu0 %v213_v0 }
   0xa   :  { %180 = vmatpush3.bf16.msra.mxu0 %v199_v3 }
   0xb   :  { %181 = vmatprep.subr.bf16.mxu0 %v213_v0 }
   0xe   :  { %182 = vmatpush3.bf16.msra.mxu0 %v200_v4 }
   0xf   :  { %183 = vmatprep.subr.bf16.mxu0 %v213_v0 }
  0x12   :  { %184 = vmatpush3.bf16.msra.mxu0 %v201_v5 }
  0x13   :  { %185 = vmatprep.subr.bf16.mxu0 %v213_v0 }
  0x16   :  { %186 = vmatpush3.bf16.msra.mxu0 %v202_v6 }
  0x17   :  { %187 = vmatprep.subr.bf16.mxu0 %v213_v0 }
  0x1a   :  { %188 = vmatpush3.bf16.msra.mxu0 %v203_v7 }
  0x1b   :  { %189 = vmatprep.subr.bf16.mxu0 %v213_v0 }
  0x1e   :  { %190 = vmatpush3.bf16.msra.mxu0 %v204_v8 }
  0x21   :  { %192 = vmatmul.mubr.bf16.vlgmr.msra.gmra.mxu0 %v17_v11 }
  0xe1   :  { %v123_v13 = vpop.f32.mrf.mxu0 }
  0xe2   :  { %v124_v14 = vadd.f32 %v157_v12, %v123_v13 }
  0xe3   :  { %v193_v15 = vpop.f32.mrf.mxu0 }
  0xe4   :  { %v130_v16 = vsub.f32 0.0, %v124_v14 }
  0xe5   :  { %v126_v17 = vpop.f32.mrf.mxu0 }
  0xe6   :  { %v132_v18 = vmul.f32 1.442695, %v130_v16  ;;  %v127_v19 = vadd.f32 %v157_v12, %v126_v17 }
  0xe7   :  { %v194_v20 = vpop.f32.mrf.mxu0 }
  0xe8   :  { %205 = vpow2.f32 %v132_v18  ;;  %v131_v21 = vsub.f32 0.0, %v127_v19 }
  0xea   :  { %v134_v22 = vmul.f32 1.442695, %v131_v21 }
  0xec   :  { %207 = vpow2.f32 %v134_v22 }
  0xf5   :  { %v206_v23 = vpop.eup %205 }
  0xf6   :  { %v136_v24 = vadd.f32 1.0, %v206_v23 }
  0xf8   :  { %209 = vrcp.f32 %v136_v24 }
  0xf9   :  { %v208_v25 = vpop.eup %207 }
  0xfa   :  { %v137_v26 = vadd.f32 1.0, %v208_v25 }
  0xfc   :  { %211 = vrcp.f32 %v137_v26 }
 0x105   :  { %v210_v27 = vpop.eup %209 }
 0x106   :  { %v140_v28 = vmul.f32 %v210_v27, %v124_v14 }
 0x108   :  { %v148_v29 = vadd.f32 %v140_v28, %v15_v9 }
 0x109   :  { %v212_v30 = vpop.eup %211 }
 0x10a   :  { %150 = vst [vmem:[%s277_s3] sm:$0xff] %v148_v29  ;;  %v141_v31 = vmul.f32 %v212_v30, %v127_v19 }
 0x10c   :  { %v149_v32 = vadd.f32 %v141_v31, %v16_v10 }
 0x10e   :  { %151 = vst [vmem:[%s277_s3 + $0x8] sm:$0xff] %v149_v32 }

</bundles_post_ra>
